<compile_context>
chip_gen: v7x
topology: tpu7x:2x2x1
jax: 0.10.0
libtpu: 0.0.40
codegen_flags: <defaults>
</compile_context>

<pallas_src>
import functools

import jax
import jax.numpy as jnp
from jax import lax
from jax.experimental import pallas as pl
from jax.experimental.pallas import tpu as pltpu

LANE = 128  # TPU lane width


def _round_up(x, m):
    return ((x + m - 1) // m) * m


def _device_kind():
    try:
        return jax.devices()[0].device_kind.lower()
    except Exception:
        return ""


def _chip_params():
    """Per-generation VMEM cap / preferred expert-block width / max K tile."""
    kind = _device_kind()
    if "v7" in kind:
        # 64 MiB physical VMEM per TensorCore -> tighter scoped cap, smaller K tiles
        return dict(vmem_cap=52 << 20, pref_te=256, tk_cap=512)
    if "v6" in kind:
        return dict(vmem_cap=104 << 20, pref_te=256, tk_cap=2048)
    if "v5" in kind or "v4" in kind:
        return dict(vmem_cap=104 << 20, pref_te=128, tk_cap=2048)
    # unknown chip: be conservative
    return dict(vmem_cap=52 << 20, pref_te=128, tk_cap=512)


def _vmem_bytes(T, tk, te, C, in_size, out_size):
    """Audited VMEM working set for one grid step."""
    x_blk = 2 * T * tk * in_size               # double-buffered x tile
    w_blk = 2 * te * tk * in_size              # double-buffered weight tile
    b_blk = 2 * te * 4                         # bias tile
    acc = T * te * 4                           # f32 accumulator scratch
    outs = (T * te * out_size                  # logits   (Buffered(1))
            + T * te * 4                       # probs    (Buffered(1), f32)
            + C * te * out_size                # top vals (Buffered(1))
            + C * te * 4)                      # top idx  (Buffered(1))
    topk_sc = C * te * 8                       # tv/ti staging scratch
    fin_tmp = 6 * T * te * 4                   # exp / iota / masks / fori carry
    return x_blk + w_blk + b_blk + acc + outs + topk_sc + fin_tmp


def _choose_tiling(T, D, E, C, in_size, out_size):
    p = _chip_params()
    cap, pref_te, tk_cap = p["vmem_cap"], p["pref_te"], p["tk_cap"]

    # 256-lane expert blocks only if the (padded) expert count warrants it.
    te = 256 if (pref_te >= 256 and _round_up(E, LANE) >= 256) else LANE

    def pick_tk(te_):
        # Prefer the whole D resident (n_kk == 1) if it fits the budget.
        if D <= tk_cap and _vmem_bytes(T, D, te_, C, in_size, out_size) <= cap:
            return D
        tk_ = min(tk_cap, _round_up(D, LANE))
        while tk_ > 256 and _vmem_bytes(T, tk_, te_, C, in_size, out_size) > cap:
            tk_ = max(256, _round_up(tk_ // 2, LANE))
        return tk_

    tk = pick_tk(te)
    if te > LANE and _vmem_bytes(T, tk, te, C, in_size, out_size) > cap:
        te = LANE                     # fall back to 128-lane expert blocks
        tk = pick_tk(te)

    budget = _vmem_bytes(T, tk, te, C, in_size, out_size)
    vmem_limit = max(32 << 20, min(int(budget * 1.25) + (1 << 20), cap))
    return te, tk, int(vmem_limit)


def _router_kernel(x_ref, w_ref, b_ref,
                   logits_ref, probs_ref, tv_ref, ti_ref,
                   acc_ref, tv_sc, ti_sc,
                   *, expert_capacity, approx_recip):
    k_id = pl.program_id(1)
    n_k = pl.num_programs(1)

    @pl.when(k_id == 0)
    def _init():
        acc_ref[...] = jnp.zeros_like(acc_ref)

    # ---- linear: accumulate x @ W.T in f32 (MXU, native-dtype operands) ----
    acc_ref[...] += lax.dot_general(
        x_ref[...], w_ref[...],
        dimension_numbers=(((1,), (1,)), ((), ())),   # contract D with D
        preferred_element_type=jnp.float32)

    @pl.when(k_id == n_k - 1)
    def _finalize():
        # logits in x.dtype, like the nn.Linear output in the reference
        logits = (acc_ref[...] + b_ref[...]).astype(logits_ref.dtype)
        logits_ref[...] = logits

        # softmax over the TOKEN axis (dim=0) in router_dtype, computed from
        # the x.dtype logits: F.softmax(logits, dim=0, dtype=router_dtype)
        lg = logits.astype(jnp.float32)
        m = jnp.max(lg, axis=0, keepdims=True)
        e = jnp.exp(lg - m)
        denom = jnp.sum(e, axis=0, keepdims=True)           # (1, te)
        # one reciprocal per expert column + a (T, te) multiply instead of a
        # (T, te) divide; approx=True pushes it to the EUP slot (~1e-4 rel err)
        probs = e * pl.reciprocal(denom, approx=approx_recip)
        probs_ref[...] = probs.astype(probs_ref.dtype)

        # ---- expert-choice top-k over tokens, per expert column ----
        num_tokens = lg.shape[0]
        tok_idx = lax.broadcasted_iota(jnp.int32, probs.shape, 0)
        neg_inf = jnp.float32(-jnp.inf)
        big_idx = jnp.int32(num_tokens)

        def body(c, p):
            mx = jnp.max(p, axis=0, keepdims=True)               # (1, te) XLU
            eq = p == mx                                         # (T, te) mask
            # ties -> smallest token index (matches torch.topk / lax.top_k)
            amax = jnp.min(jnp.where(eq, tok_idx, big_idx),
                           axis=0, keepdims=True)                # (1, te) XLU
            tv_sc[pl.ds(c, 1), :] = mx
            ti_sc[pl.ds(c, 1), :] = amax
            # knock out exactly the picked token; only the small bool mask and
            # the f32 carry are live across the reduces (no (T, te) i32
            # temporary is materialized).
            return jnp.where(eq & (tok_idx == amax), neg_inf, p)

        lax.fori_loop(0, expert_capacity, body, probs, unroll=2)

        # dense, write-once stores to the (single-buffered) pipelined outputs
        tv_ref[...] = tv_sc[...].astype(tv_ref.dtype)
        ti_ref[...] = ti_sc[...]


def expert_choice_router(x, weight, bias, k, expert_capacity,
                         router_dtype=jnp.float32,
                         approx_softmax_recip=False):
    """x: (num_tokens, d_model); weight: (num_experts, d_model); bias: (num_experts,).

    Returns (logits, probs, expert_probs, expert_indices) matching the PyTorch
    module: logits (T, E) in x.dtype, probs (T, E) in router_dtype,
    expert_probs (E, capacity) in x.dtype, expert_indices (E, capacity) int32.
    `k` is accepted for API parity but unused (as in the reference forward).
    """
    del k
    T, D = x.shape
    E = weight.shape[0]
    C = int(expert_capacity)
    if C > T:
        raise ValueError(
            f"expert_capacity ({C}) > num_tokens ({T}); torch.topk would fail.")
    if bias is None:
        bias = jnp.zeros((E,), dtype=jnp.float32)

    in_size = x.dtype.itemsize
    out_size = x.dtype.itemsize
    te, tk, vmem_limit = _choose_tiling(T, D, E, C, in_size, out_size)

    # --- lane-pad experts to a multiple of te -> dense (unmasked) stores ---
    E_pad = _round_up(E, te)
    # --- contraction tiling over D (pad only if actually needed) ---
    D_pad = tk if tk >= D else _round_up(D, tk)

    x_p = x if D_pad == D else jnp.pad(x, ((0, 0), (0, D_pad - D)))
    w_p = weight if D_pad == D else jnp.pad(weight, ((0, 0), (0, D_pad - D)))
    if E_pad != E:
        w_p = jnp.pad(w_p, ((0, E_pad - E), (0, 0)))
    b_p = jnp.pad(bias.astype(jnp.float32), (0, E_pad - E)).reshape(1, E_pad)

    n_e = E_pad // te
    n_kk = D_pad // tk

    kernel = functools.partial(_router_kernel, expert_capacity=C,
                               approx_recip=approx_softmax_recip)

    def out_spec(shape, imap):
        # Outputs are written once (last kk step): single-buffer them to halve
        # their VMEM footprint. Fall back gracefully if the kwarg is absent.
        try:
            return pl.BlockSpec(shape, imap, pipeline_mode=pl.Buffered(1))
        except (TypeError, AttributeError):
            return pl.BlockSpec(shape, imap)

    logits, probs, tv, ti = pl.pallas_call(
        kernel,
        out_shape=(
            jax.ShapeDtypeStruct((T, E_pad), x.dtype),        # logits
            jax.ShapeDtypeStruct((T, E_pad), router_dtype),   # probs
            jax.ShapeDtypeStruct((C, E_pad), x.dtype),        # top-k values
            jax.ShapeDtypeStruct((C, E_pad), jnp.int32),      # top-k indices
        ),
        grid_spec=pltpu.PrefetchScalarGridSpec(
            num_scalar_prefetch=0,
            grid=(n_e, n_kk),                    # experts outer, reduction last
            in_specs=[
                pl.BlockSpec((T, tk), lambda e, kk: (0, kk)),     # x
                pl.BlockSpec((te, tk), lambda e, kk: (e, kk)),    # weight (E, D)
                pl.BlockSpec((1, te), lambda e, kk: (0, e)),      # bias
            ],
            out_specs=[
                out_spec((T, te), lambda e, kk: (0, e)),          # logits
                out_spec((T, te), lambda e, kk: (0, e)),          # probs
                out_spec((C, te), lambda e, kk: (0, e)),          # top values
                out_spec((C, te), lambda e, kk: (0, e)),          # top indices
            ],
            scratch_shapes=[
                pltpu.VMEM((T, te), jnp.float32),                 # f32 acc
                pltpu.VMEM((C, te), jnp.float32),                 # tv staging
                pltpu.VMEM((C, te), jnp.int32),                   # ti staging
            ]),
        compiler_params=pltpu.CompilerParams(
            dimension_semantics=("parallel", "arbitrary"),
            vmem_limit_bytes=vmem_limit),
    )(x_p, w_p, b_p)

    # slice off expert padding; transpose top-k to (E, capacity) as glue
    logits = logits[:, :E]
    probs = probs[:, :E]
    expert_probs = tv[:, :E].T
    expert_indices = ti[:, :E].T
    return logits, probs, expert_probs, expert_indices


def _reference(x, weight, bias, expert_capacity, router_dtype=jnp.float32):
    logits = (x.astype(jnp.float32) @ weight.T.astype(jnp.float32)
              + bias.astype(jnp.float32)).astype(x.dtype)
    probs = jax.nn.softmax(logits.astype(router_dtype), axis=0)
    tv, ti = lax.top_k(probs.T, expert_capacity)     # over tokens per expert
    return logits, probs, tv.astype(x.dtype), ti.astype(jnp.int32)


if __name__ == "__main__":
    key = jax.random.PRNGKey(0)
    num_tokens, d_model, num_experts = 8, 32, 4
    expert_capacity, k = 2, 1

    kx, kw, kb = jax.random.split(key, 3)
    x = jax.random.normal(kx, (num_tokens, d_model), dtype=jnp.float32)
    # deterministic nn.Linear-like init (uniform in +/- 1/sqrt(d_model))
    bound = 1.0 / (d_model ** 0.5)
    weight = jax.random.uniform(kw, (num_experts, d_model),
                                minval=-bound, maxval=bound, dtype=jnp.float32)
    bias = jax.random.uniform(kb, (num_experts,),
                              minval=-bound, maxval=bound, dtype=jnp.float32)

    outs = expert_choice_router(x, weight, bias, k, expert_capacity)
    outs = jax.block_until_ready(outs)
    logits, probs, expert_probs, expert_indices = outs

    # sanity-check against a plain-JAX reference
    r_logits, r_probs, r_ep, r_ei = _reference(x, weight, bias, expert_capacity)
    assert logits.shape == (num_tokens, num_experts)
    assert probs.shape == (num_tokens, num_experts)
    assert expert_probs.shape == (num_experts, expert_capacity)
    assert expert_indices.shape == (num_experts, expert_capacity)
    assert jnp.allclose(logits, r_logits, atol=1e-5)
    assert jnp.allclose(probs, r_probs, atol=1e-5)
    assert jnp.allclose(expert_probs, r_ep, atol=1e-5)
    assert jnp.array_equal(expert_indices, r_ei)

    print("KERNEL_OK")
</pallas_src>

<mosaic_0001>
module attributes {stable_mosaic.version = 11 : i64} {
  func.func @_router_kernel(%arg0: i32, %arg1: i32, %arg2: memref<8x32xf32, #tpu.memory_space<vmem>>, %arg3: memref<128x32xf32, #tpu.memory_space<vmem>>, %arg4: memref<1x128xf32, #tpu.memory_space<vmem>>, %arg5: memref<8x128xf32, #tpu.memory_space<vmem>>, %arg6: memref<8x128xf32, #tpu.memory_space<vmem>>, %arg7: memref<2x128xf32, #tpu.memory_space<vmem>>, %arg8: memref<2x128xi32, #tpu.memory_space<vmem>>, %arg9: memref<8x128xf32, #tpu.memory_space<vmem>>, %arg10: memref<2x128xf32, #tpu.memory_space<vmem>>, %arg11: memref<2x128xi32, #tpu.memory_space<vmem>>) attributes {dimension_semantics = [#tpu.dimension_semantics<parallel>, #tpu.dimension_semantics<arbitrary>], iteration_bounds = array<i64: 1, 1>, scalar_prefetch = 0 : i64, scratch_operands = 3 : i64, tpu.core_type = #tpu.core_type<tc>, window_params = [{transform_indices = @transform_0, window_bounds = array<i64: 8, 32>}, {transform_indices = @transform_1, window_bounds = array<i64: 128, 32>}, {transform_indices = @transform_2, window_bounds = array<i64: 1, 128>}, {pipeline_mode = #tpu.pipeline_mode<synchronous>, transform_indices = @transform_3, window_bounds = array<i64: 8, 128>}, {pipeline_mode = #tpu.pipeline_mode<synchronous>, transform_indices = @transform_4, window_bounds = array<i64: 8, 128>}, {pipeline_mode = #tpu.pipeline_mode<synchronous>, transform_indices = @transform_5, window_bounds = array<i64: 2, 128>}, {pipeline_mode = #tpu.pipeline_mode<synchronous>, transform_indices = @transform_6, window_bounds = array<i64: 2, 128>}]} {
    %c0_i32 = arith.constant 0 : i32
    %0 = arith.cmpi eq, %arg1, %c0_i32 : i32
    %1 = arith.extui %0 : i1 to i32
    %c0_i32_0 = arith.constant 0 : i32
    %2 = arith.cmpi ne, %1, %c0_i32_0 : i32
    scf.if %2 {
      %cst_10 = arith.constant 0.000000e+00 : f32
      %12 = vector.broadcast %cst_10 : f32 to vector<8x128xf32>
      %c0_11 = arith.constant 0 : index
      %c0_12 = arith.constant 0 : index
      %13 = vector.load %arg9[%c0_11, %c0_12] : memref<8x128xf32, #tpu.memory_space<vmem>>, vector<8x128xf32>
      tpu.vector_store %arg9[%c0_11, %c0_12], %12 {strides = array<i32>} : memref<8x128xf32, #tpu.memory_space<vmem>>, vector<8x128xf32>,
    } else {
    }
    %c0 = arith.constant 0 : index
    %c0_1 = arith.constant 0 : index
    %3 = vector.load %arg9[%c0, %c0_1] : memref<8x128xf32, #tpu.memory_space<vmem>>, vector<8x128xf32>
    %c0_2 = arith.constant 0 : index
    %c0_3 = arith.constant 0 : index
    %4 = vector.load %arg2[%c0_2, %c0_3] : memref<8x32xf32, #tpu.memory_space<vmem>>, vector<8x32xf32>
    %c0_4 = arith.constant 0 : index
    %c0_5 = arith.constant 0 : index
    %5 = vector.load %arg3[%c0_4, %c0_5] : memref<128x32xf32, #tpu.memory_space<vmem>>, vector<128x32xf32>
    %cst = arith.constant dense<0.000000e+00> : vector<8x128xf32>
    %6 = tpu.matmul %4, %5, %cst {dimension_numbers = #tpu.dot_dimension_numbers<[1], [1], [0], [0], [0, 0, 1, 0], [], []>} : vector<8x32xf32>, vector<128x32xf32>, vector<8x128xf32> -> vector<8x128xf32>
    %7 = arith.addf %3, %6 : vector<8x128xf32>
    %c0_6 = arith.constant 0 : index
    %c0_7 = arith.constant 0 : index
    %8 = vector.load %arg9[%c0_6, %c0_7] : memref<8x128xf32, #tpu.memory_space<vmem>>, vector<8x128xf32>
    tpu.vector_store %arg9[%c0_6, %c0_7], %7 {strides = array<i32>} : memref<8x128xf32, #tpu.memory_space<vmem>>, vector<8x128xf32>,
    %c0_i32_8 = arith.constant 0 : i32
    %9 = arith.cmpi eq, %arg1, %c0_i32_8 : i32
    %10 = arith.extui %9 : i1 to i32
    %c0_i32_9 = arith.constant 0 : i32
    %11 = arith.cmpi ne, %10, %c0_i32_9 : i32
    scf.if %11 {
      %c0_10 = arith.constant 0 : index
      %c0_11 = arith.constant 0 : index
      %12 = vector.load %arg9[%c0_10, %c0_11] : memref<8x128xf32, #tpu.memory_space<vmem>>, vector<8x128xf32>
      %c0_12 = arith.constant 0 : index
      %c0_13 = arith.constant 0 : index
      %13 = vector.load %arg4[%c0_12, %c0_13] : memref<1x128xf32, #tpu.memory_space<vmem>>, vector<1x128xf32>
      %14 = vector.broadcast %13 : vector<1x128xf32> to vector<8x128xf32>
      %15 = arith.addf %12, %14 : vector<8x128xf32>
      %c0_14 = arith.constant 0 : index
      %c0_15 = arith.constant 0 : index
      %16 = vector.load %arg5[%c0_14, %c0_15] : memref<8x128xf32, #tpu.memory_space<vmem>>, vector<8x128xf32>
      tpu.vector_store %arg5[%c0_14, %c0_15], %15 {strides = array<i32>} : memref<8x128xf32, #tpu.memory_space<vmem>>, vector<8x128xf32>,
      %cst_16 = arith.constant dense<0xFF800000> : vector<128xf32>
      %17 = vector.multi_reduction <maximumf>, %15, %cst_16 [0] : vector<8x128xf32> to vector<128xf32>
      %18 = vector.shape_cast %17 : vector<128xf32> to vector<1x128xf32>
      %19 = vector.broadcast %18 : vector<1x128xf32> to vector<8x128xf32>
      %20 = arith.subf %15, %19 : vector<8x128xf32>
      %21 = math.exp %20 : vector<8x128xf32>
      %cst_17 = arith.constant dense<0.000000e+00> : vector<128xf32>
      %22 = vector.multi_reduction <add>, %21, %cst_17 [0] : vector<8x128xf32> to vector<128xf32>
      %23 = vector.shape_cast %22 : vector<128xf32> to vector<1x128xf32>
      %24 = tpu.reciprocal %23 : vector<1x128xf32> -> vector<1x128xf32>
      %25 = vector.broadcast %24 : vector<1x128xf32> to vector<8x128xf32>
      %26 = arith.mulf %21, %25 : vector<8x128xf32>
      %c0_18 = arith.constant 0 : index
      %c0_19 = arith.constant 0 : index
      %27 = vector.load %arg6[%c0_18, %c0_19] : memref<8x128xf32, #tpu.memory_space<vmem>>, vector<8x128xf32>
      tpu.vector_store %arg6[%c0_18, %c0_19], %26 {strides = array<i32>} : memref<8x128xf32, #tpu.memory_space<vmem>>, vector<8x128xf32>,
      %28 = tpu.iota {dimensions = array<i32: 0>} : vector<8x128xi32>
      %c8_i32 = arith.constant 8 : i32
      %cst_20 = arith.constant 0xFF800000 : f32
      %c0_i32_21 = arith.constant 0 : i32
      %cst_22 = arith.constant dense<0xFF800000> : vector<128xf32>
      %29 = vector.multi_reduction <maximumf>, %26, %cst_22 [0] : vector<8x128xf32> to vector<128xf32>
      %30 = vector.shape_cast %29 : vector<128xf32> to vector<1x128xf32>
      %31 = vector.broadcast %30 : vector<1x128xf32> to vector<8x128xf32>
      %32 = arith.cmpf oeq, %26, %31 : vector<8x128xf32>
      %33 = vector.broadcast %c8_i32 : i32 to vector<8x128xi32>
      %34 = arith.select %32, %28, %33 : vector<8x128xi1>, vector<8x128xi32>
      %cst_23 = arith.constant dense<2147483647> : vector<128xi32>
      %35 = vector.multi_reduction <minsi>, %34, %cst_23 [0] : vector<8x128xi32> to vector<128xi32>
      %36 = vector.shape_cast %35 : vector<128xi32> to vector<1x128xi32>
      %37 = arith.index_cast %c0_i32_21 : i32 to index
      %c0_24 = arith.constant 0 : index
      %38 = vector.load %arg10[%37, %c0_24] : memref<2x128xf32, #tpu.memory_space<vmem>>, vector<1x128xf32>
      tpu.vector_store %arg10[%37, %c0_24], %30 {strides = array<i32>} : memref<2x128xf32, #tpu.memory_space<vmem>>, vector<1x128xf32>,
      %39 = arith.index_cast %c0_i32_21 : i32 to index
      %c0_25 = arith.constant 0 : index
      %40 = vector.load %arg11[%39, %c0_25] : memref<2x128xi32, #tpu.memory_space<vmem>>, vector<1x128xi32>
      tpu.vector_store %arg11[%39, %c0_25], %36 {strides = array<i32>} : memref<2x128xi32, #tpu.memory_space<vmem>>, vector<1x128xi32>,
      %41 = vector.broadcast %36 : vector<1x128xi32> to vector<8x128xi32>
      %42 = arith.cmpi eq, %28, %41 : vector<8x128xi32>
      %43 = arith.andi %32, %42 : vector<8x128xi1>
      %44 = vector.broadcast %cst_20 : f32 to vector<8x128xf32>
      %45 = arith.select %43, %44, %26 : vector<8x128xi1>, vector<8x128xf32>
      %c1_i32 = arith.constant 1 : i32
      %cst_26 = arith.constant dense<0xFF800000> : vector<128xf32>
      %46 = vector.multi_reduction <maximumf>, %45, %cst_26 [0] : vector<8x128xf32> to vector<128xf32>
      %47 = vector.shape_cast %46 : vector<128xf32> to vector<1x128xf32>
      %48 = vector.broadcast %47 : vector<1x128xf32> to vector<8x128xf32>
      %49 = arith.cmpf oeq, %45, %48 : vector<8x128xf32>
      %50 = vector.broadcast %c8_i32 : i32 to vector<8x128xi32>
      %51 = arith.select %49, %28, %50 : vector<8x128xi1>, vector<8x128xi32>
      %cst_27 = arith.constant dense<2147483647> : vector<128xi32>
      %52 = vector.multi_reduction <minsi>, %51, %cst_27 [0] : vector<8x128xi32> to vector<128xi32>
      %53 = vector.shape_cast %52 : vector<128xi32> to vector<1x128xi32>
      %54 = arith.index_cast %c1_i32 : i32 to index
      %c0_28 = arith.constant 0 : index
      %55 = vector.load %arg10[%54, %c0_28] : memref<2x128xf32, #tpu.memory_space<vmem>>, vector<1x128xf32>
      tpu.vector_store %arg10[%54, %c0_28], %47 {strides = array<i32>} : memref<2x128xf32, #tpu.memory_space<vmem>>, vector<1x128xf32>,
      %56 = arith.index_cast %c1_i32 : i32 to index
      %c0_29 = arith.constant 0 : index
      %57 = vector.load %arg11[%56, %c0_29] : memref<2x128xi32, #tpu.memory_space<vmem>>, vector<1x128xi32>
      tpu.vector_store %arg11[%56, %c0_29], %53 {strides = array<i32>} : memref<2x128xi32, #tpu.memory_space<vmem>>, vector<1x128xi32>,
      %58 = vector.broadcast %53 : vector<1x128xi32> to vector<8x128xi32>
      %59 = arith.cmpi eq, %28, %58 : vector<8x128xi32>
      %60 = arith.andi %49, %59 : vector<8x128xi1>
      %61 = vector.broadcast %cst_20 : f32 to vector<8x128xf32>
      %62 = arith.select %60, %61, %45 : vector<8x128xi1>, vector<8x128xf32>
      %c2_i32 = arith.constant 2 : i32
      %c0_30 = arith.constant 0 : index
      %c0_31 = arith.constant 0 : index
      %63 = vector.load %arg10[%c0_30, %c0_31] : memref<2x128xf32, #tpu.memory_space<vmem>>, vector<2x128xf32>
      %c0_32 = arith.constant 0 : index
      %c0_33 = arith.constant 0 : index
      %64 = vector.load %arg7[%c0_32, %c0_33] : memref<2x128xf32, #tpu.memory_space<vmem>>, vector<2x128xf32>
      tpu.vector_store %arg7[%c0_32, %c0_33], %63 {strides = array<i32>} : memref<2x128xf32, #tpu.memory_space<vmem>>, vector<2x128xf32>,
      %c0_34 = arith.constant 0 : index
      %c0_35 = arith.constant 0 : index
      %65 = vector.load %arg11[%c0_34, %c0_35] : memref<2x128xi32, #tpu.memory_space<vmem>>, vector<2x128xi32>
      %c0_36 = arith.constant 0 : index
      %c0_37 = arith.constant 0 : index
      %66 = vector.load %arg8[%c0_36, %c0_37] : memref<2x128xi32, #tpu.memory_space<vmem>>, vector<2x128xi32>
      tpu.vector_store %arg8[%c0_36, %c0_37], %65 {strides = array<i32>} : memref<2x128xi32, #tpu.memory_space<vmem>>, vector<2x128xi32>,
    } else {
    }
    return
  }
  func.func @transform_0(%arg0: i32, %arg1: i32) -> (i32, i32) {
    %c0_i32 = arith.constant 0 : i32
    %c0_i32_0 = arith.constant 0 : i32
    return %c0_i32, %arg1 : i32, i32
  }
  func.func @transform_1(%arg0: i32, %arg1: i32) -> (i32, i32) {
    %c0_i32 = arith.constant 0 : i32
    return %arg0, %arg1 : i32, i32
  }
  func.func @transform_2(%arg0: i32, %arg1: i32) -> (i32, i32) {
    %c0_i32 = arith.constant 0 : i32
    %c0_i32_0 = arith.constant 0 : i32
    return %c0_i32, %arg0 : i32, i32
  }
  func.func @transform_3(%arg0: i32, %arg1: i32) -> (i32, i32) {
    %c0_i32 = arith.constant 0 : i32
    %c0_i32_0 = arith.constant 0 : i32
    return %c0_i32, %arg0 : i32, i32
  }
  func.func @transform_4(%arg0: i32, %arg1: i32) -> (i32, i32) {
    %c0_i32 = arith.constant 0 : i32
    %c0_i32_0 = arith.constant 0 : i32
    return %c0_i32, %arg0 : i32, i32
  }
  func.func @transform_5(%arg0: i32, %arg1: i32) -> (i32, i32) {
    %c0_i32 = arith.constant 0 : i32
    %c0_i32_0 = arith.constant 0 : i32
    return %c0_i32, %arg0 : i32, i32
  }
  func.func @transform_6(%arg0: i32, %arg1: i32) -> (i32, i32) {
    %c0_i32 = arith.constant 0 : i32
    %c0_i32_0 = arith.constant 0 : i32
    return %c0_i32, %arg0 : i32, i32
  }
}

</mosaic_0001>

<bundles_post_ra>
// kernel: tpu_custom_call.1
= control target key start
LH: loop header
LB: loop body
LE: loop exit
PB: predicated region body
PF: predicated region fallthrough
CT: control target
= control target key end

     0   :  { %12 = vsyncpa [#allocation6], 0  ;;  %s675_s0 = inlined_call_operand.vmem [shape: f32[8,32], index: 0, kind: input, shape index: {}]   ;;  %s676_s1 = inlined_call_operand.vmem [shape: f32[128,32], index: 1, kind: input, shape index: {}]   ;;  %s677_s2 = inlined_call_operand.vmem [shape: f32[1,128], index: 2, kind: input, shape index: {}]   ;;  %s678_s3 = inlined_call_operand.hbm [shape: f32[8,128], index: 3, kind: output, shape index: {0}]   ;;  %s679_s4 = inlined_call_operand.hbm [shape: f32[8,128], index: 4, kind: output, shape index: {1}]   ;;  %s680_s5 = inlined_call_operand.hbm [shape: f32[2,128], index: 5, kind: output, shape index: {2}]   ;;  %s681_s6 = inlined_call_operand.hbm [shape: s32[2,128], index: 6, kind: output, shape index: {3}]  }
   0x1   :  { %13 = vsyncpa [#allocation8], 0  ;;  %v28_v0 = vld [vmem:[%s676_s1] sm:$0xff]  ;;  %v29_v1 = vld [vmem:[%s676_s1 + $0x8] sm:$0xff]  ;;  %vm44_vm0 = vcmask 261120   ;;  %v508_v2 = vmov 0.0|0.0  }
   0x2   :  { %371 = vmatprep.subr.bf16.mxu0 %v508_v2  ;;  %v372_v3 = vpack.c.bf16 %v29_v1, %v28_v0  ;;  %vm558_vm1 = vmpackc.low %vm44_vm0, %vm44_vm0  ;;  %vm509_vm2 = vmmov 0   ;;  %v510_v5 = vmov 0.0   ;;  %v30_v6 = vld [vmem:[%s676_s1 + $0x10] sm:$0xff]  ;;  %v31_v7 = vld [vmem:[%s676_s1 + $0x18] sm:$0xff] }
   0x3   :  { %368 = vmatprep.mubr.msk.f32.mxu0 %vm509_vm2, %v510_v5 }
   0x4   :  { %374 = vmatpush3.bf16.xpose.msk.msra.mxu0 %vm558_vm1, %v372_v3 }
   0x5   :  { %375 = vmatprep.subr.bf16.mxu0 %v508_v2 }
   0x6   :  { %14 = vsyncpa [#allocation11], 0  ;;  %v376_v8 = vpack.c.bf16 %v31_v7, %v30_v6  ;;  %v32_v9 = vld [vmem:[%s676_s1 + $0x20] sm:$0xff]  ;;  %v33_v10 = vld [vmem:[%s676_s1 + $0x28] sm:$0xff]  ;;  %s511_s9 = smov [#allocation5]  }
   0x7   :  { %v380_v11 = vpack.c.bf16 %v33_v10, %v32_v9  ;;  %v34_v12 = vld [vmem:[%s676_s1 + $0x30] sm:$0xff]  ;;  %v35_v13 = vld [vmem:[%s676_s1 + $0x38] sm:$0xff]  ;;  %v36_v15 = vld [vmem:[%s676_s1 + $0x40] sm:$0xff]  ;;  %s252_s10 = sshll.u32 %s511_s9, 4  ;;  %s253_s10 = int_to_ptr.vmem [resolvable:$true] %s252_s10 }
   0x8   :  { %v384_v14 = vpack.c.bf16 %v35_v13, %v34_v12  ;;  %v37_v16 = vld [vmem:[%s676_s1 + $0x48] sm:$0xff]  ;;  %v38_v18 = vld [vmem:[%s676_s1 + $0x50] sm:$0xff]  ;;  %v39_v19 = vld [vmem:[%s676_s1 + $0x58] sm:$0xff]  ;;  %p419_p1 = scmp.lt.s32.totalorder %s253_s10, %s253_s10 }
   0x9   :  { %v388_v17 = vpack.c.bf16 %v37_v16, %v36_v15  ;;  %v392_v20 = vpack.c.bf16 %v39_v19, %v38_v18  ;;  %v40_v21 = vld [vmem:[%s676_s1 + $0x60] sm:$0xff]  ;;  %v41_v22 = vld [vmem:[%s676_s1 + $0x68] sm:$0xff]  ;;  %v42_v24 = vld [vmem:[%s676_s1 + $0x70] sm:$0xff] }
   0xa   :  { %v396_v23 = vpack.c.bf16 %v41_v22, %v40_v21  ;;  %v43_v25 = vld [vmem:[%s676_s1 + $0x78] sm:$0xff]  ;;  %v27_v27 = vld [vmem:[%s675_s0] sm:$0xff]  ;;  %s414_s1 = scalar_lea.vmem %s253_s10, 128 }
   0xb   :  { %v400_v26 = vpack.c.bf16 %v43_v25, %v42_v24  ;;  %v318_v28 = vld [vmem:[%s677_s2] ss:$0 sm:$0xff]  ;;  %p415_p0 = scmp.ne.s32.totalorder %s253_s10, %s414_s1  ;;  %p420_p2 = scmp.lt.s32.totalorder %s414_s1, %s414_s1 }
   0xc   :  { %378 = vmatpush3.bf16.xpose.msk.msra.mxu0 %vm558_vm1, %v376_v8 }
   0xd   :  { %379 = vmatprep.subr.bf16.mxu0 %v508_v2  ;;  %p421_p3 = por %p420_p2, %p419_p1 }
   0xf   :  { %p422_p4 = pnand %p421_p3, %p415_p0 }
  0x14   :  { %382 = vmatpush3.bf16.xpose.msk.msra.mxu0 %vm558_vm1, %v380_v11 }
  0x15   :  { %383 = vmatprep.subr.bf16.mxu0 %v508_v2 }
  0x1c   :  { %386 = vmatpush3.bf16.xpose.msk.msra.mxu0 %vm558_vm1, %v384_v14 }
  0x1d   :  { %387 = vmatprep.subr.bf16.mxu0 %v508_v2 }
  0x24   :  { %390 = vmatpush3.bf16.xpose.msk.msra.mxu0 %vm558_vm1, %v388_v17 }
  0x25   :  { %391 = vmatprep.subr.bf16.mxu0 %v508_v2 }
  0x2c   :  { %394 = vmatpush3.bf16.xpose.msk.msra.mxu0 %vm558_vm1, %v392_v20 }
  0x2d   :  { %395 = vmatprep.subr.bf16.mxu0 %v508_v2 }
  0x34   :  { %398 = vmatpush3.bf16.xpose.msk.msra.mxu0 %vm558_vm1, %v396_v23 }
  0x35   :  { %399 = vmatprep.subr.bf16.mxu0 %v508_v2 }
  0x3c   :  { %402 = vmatpush3.bf16.xpose.msk.msra.mxu0 %vm558_vm1, %v400_v26 }
  0x43   :  { %369 = vmatmul.mubr.msk.f32.vlgmr.msra.gmra.mrb[0].mxu0 %vm44_vm0, %v27_v27 }
 0x116   :  { %v162_v29 = vpop.f32.mrb[0].mxu0 }
 0x117   :  { %v179_v30 = vadd.f32 %v318_v28, %v162_v29  ;;  %v370_v31 = vpop.f32.mrb[1].mxu0 }
 0x119   :  { %v181_v32 = vrot.slane %v179_v30, 4  ;;  %180 = vst [vmem:[#allocation5] sm:$0xff] %v179_v30 }
 0x11a   :  { %425 = shalt.err (!%p422_p4)
}
 0x11b   :  { %s426_s12 = scalar_lea.hbm %s678_s3, 128 }
 0x11c   :  { %p427_p5 = scmp.ne.s32.totalorder %s678_s3, %s426_s12  ;;  %p430_p6 = scmp.lt.u32.totalorder %s426_s12, %s678_s3 }
 0x11e   :  { %p432_p7 = pnand %p430_p6, %p427_p5 }
 0x120   :  { %435 = shalt.err (!%p432_p7)
}
 0x121   :  { %255 = dma.vmem_to_hbm [thread:$0]  %s253_s10, 128, %s678_s3, [#allocation6]   ;;  %v182_v33 = vmax.f32 %v179_v30, %v181_v32 }
 0x122   :  { %s512_s18 = smov [#allocation7]  }
 0x123   :  { %v183_v34 = vrot.slane %v182_v33, 2  ;;  %s262_s19 = sshll.u32 %s512_s18, 4  ;;  %s263_s19 = int_to_ptr.vmem [resolvable:$true] %s262_s19 }
 0x124   :  { %s436_s3 = scalar_lea.vmem %s263_s19, 128  ;;  %p441_p9 = scmp.lt.s32.totalorder %s263_s19, %s263_s19 }
 0x125   :  { %v184_v35 = vmax.f32 %v182_v33, %v183_v34  ;;  %p437_p8 = scmp.ne.s32.totalorder %s263_s19, %s436_s3  ;;  %p442_p10 = scmp.lt.s32.totalorder %s436_s3, %s436_s3 }
 0x127   :  { %v185_v36 = vrot.slane %v184_v35, 1  ;;  %p443_p11 = por %p442_p10, %p441_p9 }
 0x129   :  { %v186_v37 = vmax.f32 %v184_v35, %v185_v36  ;;  %p444_p12 = pnand %p443_p11, %p437_p8 }
 0x12b   :  { %v187_v38 = vsub.f32 %v179_v30, %v186_v37 }
 0x12d   :  { %v188_v39 = vmul.f32 1.442695, %v187_v38 }
 0x12f   :  { %410 = vpow2.f32 %v188_v39 }
 0x139   :  { %v411_v40 = vpop.eup %410 }
 0x13a   :  { %v190_v41 = vrot.slane %v411_v40, 4 }
 0x13c   :  { %v191_v42 = vadd.f32 %v411_v40, %v190_v41 }
 0x13e   :  { %v192_v43 = vrot.slane %v191_v42, 2 }
 0x140   :  { %v193_v44 = vadd.f32 %v192_v43, %v191_v42 }
 0x142   :  { %v194_v45 = vrot.slane %v193_v44, 1 }
 0x144   :  { %v195_v46 = vadd.f32 %v194_v45, %v193_v44 }
 0x146   :  { %412 = vrcp.f32 %v195_v46 }
 0x150   :  { %v413_v47 = vpop.eup %412 }
 0x151   :  { %v197_v48 = vmul.f32 %v413_v47, %v411_v40 }
 0x153   :  { %198 = vst [vmem:[#allocation7] sm:$0xff] %v197_v48  ;;  %v201_v49 = vrot.slane %v197_v48, 4 }
 0x154   :  { %447 = shalt.err (!%p444_p12)
}
 0x155   :  { %s448_s22 = scalar_lea.hbm %s679_s4, 128 }
 0x156   :  { %p449_p13 = scmp.ne.s32.totalorder %s679_s4, %s448_s22  ;;  %p452_p0 = scmp.lt.u32.totalorder %s448_s22, %s679_s4 }
 0x158   :  { %p454_p1 = pnand %p452_p0, %p449_p13 }
 0x15a   :  { %457 = shalt.err (!%p454_p1)
}
 0x15b   :  { %265 = dma.vmem_to_hbm [thread:$0]  %s263_s19, 128, %s679_s4, [#allocation8]   ;;  %v202_v50 = vmax.f32 %v197_v48, %v201_v49  ;;  %v199_v52 = vlaneseq }
 0x15c   :  { %s513_s4 = smov [#allocation9]  }
 0x15d   :  { %v203_v51 = vrot.slane %v202_v50, 2  ;;  %v200_v55 = vshrl.u32 %v199_v52, 7  ;;  %s272_s29 = sshll.u32 %s513_s4, 4  ;;  %s273_s29 = int_to_ptr.vmem [resolvable:$true] %s272_s29 }
 0x15e   :  { %s458_s30 = scalar_lea.vmem %s273_s29, 32  ;;  %p463_p3 = scmp.lt.s32.totalorder %s273_s29, %s273_s29 }
 0x15f   :  { %v204_v53 = vmax.f32 %v202_v50, %v203_v51  ;;  %p459_p2 = scmp.ne.s32.totalorder %s273_s29, %s458_s30  ;;  %p464_p4 = scmp.lt.s32.totalorder %s458_s30, %s458_s30 }
 0x161   :  { %v205_v54 = vrot.slane %v204_v53, 1  ;;  %p465_p5 = por %p464_p4, %p463_p3 }
 0x163   :  { %v206_v56 = vmax.f32 %v204_v53, %v205_v54  ;;  %p466_p6 = pnand %p465_p5, %p459_p2 }
 0x165   :  { %vm207_vm3 = vcmp.eq.f32.partialorder %v197_v48, %v206_v56  ;;  %218 = vst [vmem:[#allocation3] sm:$0x1] %v206_v56 }
 0x166   :  { %v208_v57 = vsel %vm207_vm3, %v200_v55, 8 }
 0x167   :  { %v209_v58 = vrot.slane %v208_v57, 4 }
 0x169   :  { %vm210_vm4 = vcmp.lt.s32.totalorder %v208_v57, %v209_v58 }
 0x16a   :  { %v211_v59 = vsel %vm210_vm4, %v208_v57, %v209_v58 }
 0x16b   :  { %v212_v60 = vrot.slane %v211_v59, 2 }
 0x16d   :  { %vm213_vm5 = vcmp.lt.s32.totalorder %v211_v59, %v212_v60 }
 0x16e   :  { %v214_v61 = vsel %vm213_vm5, %v211_v59, %v212_v60 }
 0x16f   :  { %v215_v62 = vrot.slane %v214_v61, 1 }
 0x171   :  { %vm216_vm6 = vcmp.lt.s32.totalorder %v214_v61, %v215_v62 }
 0x172   :  { %v217_v63 = vsel %vm216_vm6, %v214_v61, %v215_v62 }
 0x173   :  { %219 = vst [vmem:[#allocation4] sm:$0x1] %v217_v63  ;;  %vm220_vm7 = vcmp.eq.s32.totalorder %v200_v55, %v217_v63 }
 0x174   :  { %vm221_vm8 = vmand %vm207_vm3, %vm220_vm7 }
 0x175   :  { %v222_v0 = vsel %vm221_vm8, -inf, %v197_v48 }
 0x176   :  { %v223_v1 = vrot.slane %v222_v0, 4 }
 0x178   :  { %v224_v2 = vmax.f32 %v222_v0, %v223_v1 }
 0x17a   :  { %v225_v3 = vrot.slane %v224_v2, 2 }
 0x17c   :  { %v226_v4 = vmax.f32 %v224_v2, %v225_v3 }
 0x17e   :  { %v227_v5 = vrot.slane %v226_v4, 1 }
 0x180   :  { %v228_v6 = vmax.f32 %v226_v4, %v227_v5 }
 0x182   :  { %vm229_vm9 = vcmp.eq.f32.partialorder %v222_v0, %v228_v6  ;;  %240 = vst [vmem:[#allocation3 + $0x1] sm:$0x1] %v228_v6 }
 0x183   :  { %v230_v7 = vsel %vm229_vm9, %v200_v55, 8 }
 0x184   :  { %v231_v8 = vrot.slane %v230_v7, 4 }
 0x186   :  { %vm232_vm10 = vcmp.lt.s32.totalorder %v230_v7, %v231_v8 }
 0x187   :  { %v233_v9 = vsel %vm232_vm10, %v230_v7, %v231_v8 }
 0x188   :  { %v234_v10 = vrot.slane %v233_v9, 2 }
 0x189   :  { %v242_v11 = vld [vmem:[#allocation3] sm:$0x3] }
 0x18a   :  { %vm235_vm11 = vcmp.lt.s32.totalorder %v233_v9, %v234_v10  ;;  %243 = vst [vmem:[#allocation9] sm:$0x3] %v242_v11 }
 0x18b   :  { %v236_v12 = vsel %vm235_vm11, %v233_v9, %v234_v10 }
 0x18c   :  { %469 = shalt.err (!%p466_p6)
}
 0x18d   :  { %s470_s9 = scalar_lea.hbm %s680_s5, 32 }
 0x18e   :  { %p471_p7 = scmp.ne.s32.totalorder %s680_s5, %s470_s9  ;;  %p474_p8 = scmp.lt.u32.totalorder %s470_s9, %s680_s5 }
 0x190   :  { %p476_p9 = pnand %p474_p8, %p471_p7 }
 0x192   :  { %479 = shalt.err (!%p476_p9)
}
 0x193   :  { %275 = dma.vmem_to_hbm [thread:$0]  %s273_s29, 32, %s680_s5, [#allocation8]   ;;  %v237_v13 = vrot.slane %v236_v12, 1 }
 0x194   :  { %s514_s13 = smov [#allocation10]  }
 0x195   :  { %vm238_vm12 = vcmp.lt.s32.totalorder %v236_v12, %v237_v13  ;;  %s282_s14 = sshll.u32 %s514_s13, 4  ;;  %s283_s14 = int_to_ptr.vmem [resolvable:$true] %s282_s14 }
 0x196   :  { %v239_v14 = vsel %vm238_vm12, %v236_v12, %v237_v13  ;;  %s480_s15 = scalar_lea.vmem %s283_s14, 32  ;;  %p485_p11 = scmp.lt.s32.totalorder %s283_s14, %s283_s14 }
 0x197   :  { %241 = vst [vmem:[#allocation4 + $0x1] sm:$0x1] %v239_v14  ;;  %p481_p10 = scmp.ne.s32.totalorder %s283_s14, %s480_s15  ;;  %p486_p12 = scmp.lt.s32.totalorder %s480_s15, %s480_s15 }
 0x199   :  { %p487_p13 = por %p486_p12, %p485_p11 }
 0x19b   :  { %p488_p0 = pnand %p487_p13, %p481_p10 }
 0x19e   :  { %v244_v15 = vld [vmem:[#allocation4] sm:$0x3] }
 0x19f   :  { %245 = vst [vmem:[#allocation10] sm:$0x3] %v244_v15 }
 0x1a0   :  { %491 = shalt.err (!%p488_p0)
}
 0x1a1   :  { %s492_s5 = scalar_lea.hbm %s681_s6, 32 }
 0x1a2   :  { %p493_p1 = scmp.ne.s32.totalorder %s681_s6, %s492_s5  ;;  %p496_p2 = scmp.lt.u32.totalorder %s492_s5, %s681_s6 }
 0x1a4   :  { %p498_p3 = pnand %p496_p2, %p493_p1 }
 0x1a6   :  { %501 = shalt.err (!%p498_p3)
}
 0x1a7   :  { %285 = dma.vmem_to_hbm [thread:$0]  %s283_s14, 32, %s681_s6, [#allocation11]  }
 0x1a8   :  { %502 = dma.done.wait [#allocation6], 128  }
 0x1a9   :  { %503 = vsyncadd [#allocation6], 4294967168 }
 0x1aa   :  { %504 = dma.done.wait [#allocation8], 160  }
 0x1ab   :  { %505 = vsyncadd [#allocation8], 4294967136 }
 0x1ac   :  { %506 = dma.done.wait [#allocation11], 32  }
 0x1ad   :  { %507 = vsyncadd [#allocation11], 4294967264 }
 0x1ae   :  { %298 = vsyncpa [#allocation6], 1 }
 0x1af   :  { %299 = vsyncpa [#allocation8], 1 }
 0x1b0   :  { %300 = vsyncpa [#allocation11], 1 }

</bundles_post_ra>
